<compile_context>
chip_gen: v7x
topology: tpu7x:2x2x1
jax: 0.10.0
libtpu: 0.0.40
codegen_flags: <defaults>
</compile_context>

<pallas_src>
import jax
import jax.numpy as jnp
from jax.experimental import pallas as pl
from jax.experimental.pallas import tpu as pltpu


_CHUNK = 512       # lanes per inner compute chunk (bounds vreg live ranges)
_MAX_TILE = 65536  # keeps the static inner loop and VMEM footprint bounded


def _cdiv(a, b):
    return -(-a // b)


def _round_up(x, m):
    return _cdiv(x, m) * m


def _select_tile(batch, tile_b):
    """Balanced batch tiling: big tiles, bounded padding, >=2 tiles for v7x."""
    tile_b = max(_CHUNK, min(tile_b, _MAX_TILE))
    # >= 2 tiles when the batch is big enough to split across v7x's two TCs.
    n_tiles = max(_cdiv(batch, tile_b), 2 if batch >= 2 * _CHUNK else 1)
    tb = _round_up(_cdiv(batch, n_tiles), _CHUNK)
    n_tiles = _cdiv(batch, tb)
    return tb, n_tiles, n_tiles * tb


def _mlp_kernel(x_ref, w1_ref, b1_ref, w2_ref, b2_ref, o_ref):
    # Feature-major tile: x is (d_in, tb) with the batch tile on the lane axis,
    # so both input loads and output stores are dense full-lane vld/vst.
    w1 = w1_ref[...]              # (hidden, d_in)      resident across steps
    b1 = b1_ref[...]              # (hidden, 1)
    w2 = w2_ref[...]              # (nb_action, hidden)
    b2 = b2_ref[...]              # (nb_action, 1)

    n_chunks = x_ref.shape[-1] // _CHUNK
    # Static (fully unrolled) chunk loop: ~50 live vregs per chunk, so the
    # (30, tb) hidden activation never spills even at tb = 16K-64K.
    for c in range(n_chunks):
        off = c * _CHUNK
        x = x_ref[:, pl.ds(off, _CHUNK)].astype(jnp.float32)    # (d_in, C)
        h = jnp.dot(w1, x, preferred_element_type=jnp.float32) + b1
        h = jnp.maximum(h, 0.0)                                  # ReLU
        q = jnp.dot(w2, h, preferred_element_type=jnp.float32) + b2
        o_ref[:, pl.ds(off, _CHUNK)] = q.astype(o_ref.dtype)


def network_forward_fm(state_fm, w1, b1, w2, b2, *, tile_b=16384,
                       activation_dtype=jnp.float32):
    """Feature-major fast path (recommended inside a training loop).

    state_fm: (input_size, B) activations, feature-major.
    returns:  (nb_action, B) q-values, feature-major.
    """
    d_in, batch = state_fm.shape
    hidden = w1.shape[0]
    nb_action = w2.shape[0]
    tb, n_tiles, b_pad = _select_tile(batch, tile_b)

    x = state_fm
    if b_pad != batch:
        x = jnp.pad(x, ((0, 0), (0, b_pad - batch)))
    if x.dtype != activation_dtype:
        x = x.astype(activation_dtype)

    w1c = w1.astype(jnp.float32)
    w2c = w2.astype(jnp.float32)
    b1c = b1.reshape(hidden, 1).astype(jnp.float32)
    b2c = b2.reshape(nb_action, 1).astype(jnp.float32)

    flops = 2 * batch * (d_in * hidden + hidden * nb_action)
    bytes_accessed = (batch * (d_in + nb_action) * 4
                      + (w1.size + w2.size + b1.size + b2.size) * 4)

    q_fm = pl.pallas_call(
        _mlp_kernel,
        out_shape=jax.ShapeDtypeStruct((nb_action, b_pad), jnp.float32),
        grid=(n_tiles,),
        in_specs=[
            # Streamed batch tile (double-buffered by Pallas).
            pl.BlockSpec((d_in, tb), lambda i: (0, i)),
            # Weights / biases: constant block index -> stay resident in VMEM.
            pl.BlockSpec((hidden, d_in), lambda i: (0, 0)),
            pl.BlockSpec((hidden, 1), lambda i: (0, 0)),
            pl.BlockSpec((nb_action, hidden), lambda i: (0, 0)),
            pl.BlockSpec((nb_action, 1), lambda i: (0, 0)),
        ],
        out_specs=pl.BlockSpec((nb_action, tb), lambda i: (0, i)),
        compiler_params=pltpu.CompilerParams(
            dimension_semantics=("parallel",)),
        cost_estimate=pl.CostEstimate(flops=flops, transcendentals=0,
                                      bytes_accessed=bytes_accessed),
    )(x, w1c, b1c, w2c, b2c)

    return q_fm[:, :batch]


def network_forward(state, w1, b1, w2, b2, *, tile_b=16384,
                    activation_dtype=jnp.float32):
    """PyTorch-layout forward: state (B, input_size) -> (B, nb_action).

    Only the boundary transposes live here (layout plumbing, tiny output);
    prefer `network_forward_fm` end-to-end to avoid them entirely.
    """
    q_fm = network_forward_fm(state.T, w1, b1, w2, b2, tile_b=tile_b,
                              activation_dtype=activation_dtype)
    return q_fm.T


def init_params(key, input_size, nb_action, hidden=30):
    """PyTorch nn.Linear default init: U(-1/sqrt(fan_in), 1/sqrt(fan_in)),
    weights stored in PyTorch (out_features, in_features) layout."""
    k1, k2, k3, k4 = jax.random.split(key, 4)
    bound1 = 1.0 / jnp.sqrt(jnp.float32(input_size))
    bound2 = 1.0 / jnp.sqrt(jnp.float32(hidden))
    w1 = jax.random.uniform(k1, (hidden, input_size), jnp.float32, -bound1, bound1)
    b1 = jax.random.uniform(k2, (hidden,), jnp.float32, -bound1, bound1)
    w2 = jax.random.uniform(k3, (nb_action, hidden), jnp.float32, -bound2, bound2)
    b2 = jax.random.uniform(k4, (nb_action,), jnp.float32, -bound2, bound2)
    return w1, b1, w2, b2


if __name__ == "__main__":
    input_size, nb_action = 5, 3

    key = jax.random.PRNGKey(0)
    k_params, k_s1, k_s2 = jax.random.split(key, 3)
    w1, b1, w2, b2 = init_params(k_params, input_size, nb_action)

    def reference(s):
        return jnp.maximum(s @ w1.T + b1, 0.0) @ w2.T + b2

    # Small batch, as used for single-transition action selection.
    state_small = jax.random.normal(k_s1, (4, input_size), jnp.float32)
    q_small = network_forward(state_small, w1, b1, w2, b2)
    jax.block_until_ready(q_small)
    assert q_small.shape == (4, nb_action)
    assert jnp.allclose(q_small, reference(state_small), atol=1e-5, rtol=1e-5)

    # Larger batch: multi-tile grid (>=2 tiles), batch padding, chunk loop.
    state_big = jax.random.normal(k_s2, (2500, input_size), jnp.float32)
    q_big = network_forward(state_big, w1, b1, w2, b2)
    jax.block_until_ready(q_big)
    assert q_big.shape == (2500, nb_action)
    assert jnp.allclose(q_big, reference(state_big), atol=1e-4, rtol=1e-4)

    # Feature-major fast path (no layout-plumbing HBM passes at all).
    q_fm = network_forward_fm(state_big.T, w1, b1, w2, b2)
    jax.block_until_ready(q_fm)
    assert q_fm.shape == (nb_action, 2500)
    assert jnp.allclose(q_fm.T, reference(state_big), atol=1e-4, rtol=1e-4)

    # Optional bf16 activation streaming (halves input DMA bytes).
    q_bf16 = network_forward(state_big, w1, b1, w2, b2,
                             activation_dtype=jnp.bfloat16)
    jax.block_until_ready(q_bf16)
    assert q_bf16.shape == (2500, nb_action)
    assert jnp.allclose(q_bf16, reference(state_big), atol=5e-2, rtol=5e-2)

    print("KERNEL_OK")
</pallas_src>

<mosaic_0001>
module attributes {stable_mosaic.version = 11 : i64} {
  func.func @_mlp_kernel(%arg0: i32, %arg1: memref<5x512xf32, #tpu.memory_space<vmem>>, %arg2: memref<30x5xf32, #tpu.memory_space<vmem>>, %arg3: memref<30x1xf32, #tpu.memory_space<vmem>>, %arg4: memref<3x30xf32, #tpu.memory_space<vmem>>, %arg5: memref<3x1xf32, #tpu.memory_space<vmem>>, %arg6: memref<3x512xf32, #tpu.memory_space<vmem>>) attributes {dimension_semantics = [#tpu.dimension_semantics<parallel>], iteration_bounds = array<i64: 1>, scalar_prefetch = 0 : i64, scratch_operands = 0 : i64, tpu.core_type = #tpu.core_type<tc>, window_params = [{transform_indices = @transform_0, window_bounds = array<i64: 5, 512>}, {pipeline_mode = #tpu.pipeline_mode<synchronous>, transform_indices = @transform_1, window_bounds = array<i64: 30, 5>}, {pipeline_mode = #tpu.pipeline_mode<synchronous>, transform_indices = @transform_2, window_bounds = array<i64: 30, 1>}, {pipeline_mode = #tpu.pipeline_mode<synchronous>, transform_indices = @transform_3, window_bounds = array<i64: 3, 30>}, {pipeline_mode = #tpu.pipeline_mode<synchronous>, transform_indices = @transform_4, window_bounds = array<i64: 3, 1>}, {transform_indices = @transform_5, window_bounds = array<i64: 3, 512>}]} {
    %c0 = arith.constant 0 : index
    %c0_0 = arith.constant 0 : index
    %0 = vector.load %arg2[%c0, %c0_0] : memref<30x5xf32, #tpu.memory_space<vmem>>, vector<30x5xf32>
    %c0_1 = arith.constant 0 : index
    %c0_2 = arith.constant 0 : index
    %1 = vector.load %arg3[%c0_1, %c0_2] : memref<30x1xf32, #tpu.memory_space<vmem>>, vector<30x1xf32>
    %c0_3 = arith.constant 0 : index
    %c0_4 = arith.constant 0 : index
    %2 = vector.load %arg4[%c0_3, %c0_4] : memref<3x30xf32, #tpu.memory_space<vmem>>, vector<3x30xf32>
    %c0_5 = arith.constant 0 : index
    %c0_6 = arith.constant 0 : index
    %3 = vector.load %arg5[%c0_5, %c0_6] : memref<3x1xf32, #tpu.memory_space<vmem>>, vector<3x1xf32>
    %c0_7 = arith.constant 0 : index
    %c0_8 = arith.constant 0 : index
    %4 = vector.load %arg1[%c0_7, %c0_8] : memref<5x512xf32, #tpu.memory_space<vmem>>, vector<5x512xf32>
    %cst = arith.constant dense<0.000000e+00> : vector<30x512xf32>
    %5 = tpu.matmul %0, %4, %cst {dimension_numbers = #tpu.dot_dimension_numbers<[1], [0], [0], [1], [0, 0, 1, 1], [], []>} : vector<30x5xf32>, vector<5x512xf32>, vector<30x512xf32> -> vector<30x512xf32>
    %6 = vector.broadcast %1 : vector<30x1xf32> to vector<30x512xf32>
    %7 = arith.addf %5, %6 : vector<30x512xf32>
    %cst_9 = arith.constant 0.000000e+00 : f32
    %8 = vector.broadcast %cst_9 : f32 to vector<30x512xf32>
    %9 = arith.maximumf %7, %8 : vector<30x512xf32>
    %cst_10 = arith.constant dense<0.000000e+00> : vector<3x512xf32>
    %10 = tpu.matmul %2, %9, %cst_10 {dimension_numbers = #tpu.dot_dimension_numbers<[1], [0], [0], [1], [0, 0, 1, 1], [], []>} : vector<3x30xf32>, vector<30x512xf32>, vector<3x512xf32> -> vector<3x512xf32>
    %11 = vector.broadcast %3 : vector<3x1xf32> to vector<3x512xf32>
    %12 = arith.addf %10, %11 : vector<3x512xf32>
    %c0_11 = arith.constant 0 : index
    %c0_12 = arith.constant 0 : index
    %13 = vector.load %arg6[%c0_11, %c0_12] : memref<3x512xf32, #tpu.memory_space<vmem>>, vector<3x512xf32>
    tpu.vector_store %arg6[%c0_11, %c0_12], %12 {strides = array<i32>} : memref<3x512xf32, #tpu.memory_space<vmem>>, vector<3x512xf32>,
    return
  }
  func.func @transform_0(%arg0: i32) -> (i32, i32) {
    %c0_i32 = arith.constant 0 : i32
    %c0_i32_0 = arith.constant 0 : i32
    return %c0_i32, %arg0 : i32, i32
  }
  func.func @transform_1(%arg0: i32) -> (i32, i32) {
    %c0_i32 = arith.constant 0 : i32
    %c0_i32_0 = arith.constant 0 : i32
    %c0_i32_1 = arith.constant 0 : i32
    return %c0_i32, %c0_i32_0 : i32, i32
  }
  func.func @transform_2(%arg0: i32) -> (i32, i32) {
    %c0_i32 = arith.constant 0 : i32
    %c0_i32_0 = arith.constant 0 : i32
    %c0_i32_1 = arith.constant 0 : i32
    return %c0_i32, %c0_i32_0 : i32, i32
  }
  func.func @transform_3(%arg0: i32) -> (i32, i32) {
    %c0_i32 = arith.constant 0 : i32
    %c0_i32_0 = arith.constant 0 : i32
    %c0_i32_1 = arith.constant 0 : i32
    return %c0_i32, %c0_i32_0 : i32, i32
  }
  func.func @transform_4(%arg0: i32) -> (i32, i32) {
    %c0_i32 = arith.constant 0 : i32
    %c0_i32_0 = arith.constant 0 : i32
    %c0_i32_1 = arith.constant 0 : i32
    return %c0_i32, %c0_i32_0 : i32, i32
  }
  func.func @transform_5(%arg0: i32) -> (i32, i32) {
    %c0_i32 = arith.constant 0 : i32
    %c0_i32_0 = arith.constant 0 : i32
    return %c0_i32, %arg0 : i32, i32
  }
}

</mosaic_0001>

<bundles_post_ra>
// kernel: tpu_custom_call.1
= control target key start
LH: loop header
LB: loop body
LE: loop exit
PB: predicated region body
PF: predicated region fallthrough
CT: control target
= control target key end

     0   :  { %vm68_vm0 = vcmask 1044480   ;;  %vm55_vm1 = vcmask 39936   ;;  %v531_v5 = vmov 0.0   ;;  %s627_s0 = inlined_call_operand.vmem [shape: f32[5,512], index: 0, kind: input, shape index: {}]   ;;  %s628_s1 = inlined_call_operand.vmem [shape: f32[30,5], index: 1, kind: input, shape index: {}]   ;;  %s629_s2 = inlined_call_operand.vmem [shape: f32[30,1], index: 2, kind: input, shape index: {}]   ;;  %s630_s3 = inlined_call_operand.vmem [shape: f32[3,30], index: 3, kind: input, shape index: {}]   ;;  %s631_s4 = inlined_call_operand.vmem [shape: f32[3,1], index: 4, kind: input, shape index: {}]   ;;  %s632_s5 = inlined_call_operand.hbm [shape: f32[3,512], index: 5, kind: output, shape index: {}]  }
   0x1   :  { %v32_v0 = vld [vmem:[%s627_s0 + $0x8] sm:$0x1f]  ;;  %v34_v1 = vld [vmem:[%s627_s0 + $0x18] sm:$0x1f]  ;;  %v31_v2 = vld [vmem:[%s627_s0] sm:$0x1f]  ;;  %145 = vmatprep.mubr.f32.mxu0 %v531_v5  ;;  %234 = vmatprep.mubr.f32.mxu1 %v531_v5 }
   0x2   :  { %463 = vmatprep.subr.msk.mxu0 %vm68_vm0, %v32_v0  ;;  %469 = vmatprep.subr.msk.mxu1 %vm68_vm0, %v34_v1  ;;  %v33_v3 = vld [vmem:[%s627_s0 + $0x10] sm:$0x1f]  ;;  %v21_v4 = vld [vmem:[%s628_s1] sm:$0xff] }
   0x3   :  { %464 = vmatpush1.msk.msra.mxu0 %vm68_vm0, %v31_v2  ;;  %470 = vmatpush1.msk.msra.mxu1 %vm68_vm0, %v33_v3  ;;  %v25_v6 = vld [vmem:[%s629_s2] sm:$0xff]  ;;  %v27_v7 = vld [vmem:[%s629_s2 + $0x10] sm:$0xff] }
   0x4   :  { %465 = vmatmul.mubr.msk.f32.vlgmr.msra.gmra.mrb[0].mxu0 %vm55_vm1, %v21_v4  ;;  %471 = vmatmul.mubr.msk.f32.vlgmr.msra.gmra.mrb[0].mxu1 %vm55_vm1, %v21_v4 }
   0x5   :  { %10 = vsyncpa [#allocation3], 0  ;;  %151 = vmatprep.mubr.f32.mxu0 %v531_v5  ;;  %240 = vmatprep.mubr.f32.mxu1 %v531_v5  ;;  %v22_v8 = vld [vmem:[%s628_s1 + $0x8] sm:$0xff]  ;;  %v532_v9 = vmov 0   ;;  %v28_v11 = vld [vmem:[%s629_s2 + $0x18] sm:$0x3f] }
   0x6   :  { %505 = vset.pattern.permute.xlu0 %v532_v9  ;;  %506 = vset.pattern.permute.xlu1 %v532_v9  ;;  %v26_v10 = vld [vmem:[%s629_s2 + $0x8] sm:$0xff]  ;;  %v23_v12 = vld [vmem:[%s628_s1 + $0x10] sm:$0xff]  ;;  %v30_v13 = vld [vmem:[%s631_s4] sm:$0x7]  ;;  %vm284_vm2 = vcmask 1045504   ;;  %vm533_vm3 = vmmov 1  }
   0x7   :  { %37 = vperm.xlu0 %505, %v25_v6   ;;  %47 = vperm.xlu1 %506, %v27_v7   ;;  %v24_v14 = vld [vmem:[%s628_s1 + $0x18] sm:$0x3f]  ;;  %vm486_vm4 = vmpackc.low %vm284_vm2, %vm533_vm3  ;;  %vm280_vm5 = vcmask 244736   ;;  %s534_s17 = smov [#allocation2]  }
   0x8   :  { %466 = vmatmul.mubr.msk.f32.gmra.mrb[2].mxu0 %vm55_vm1, %v22_v8  ;;  %472 = vmatmul.mubr.msk.f32.gmra.mrb[2].mxu1 %vm55_vm1, %v22_v8  ;;  %s455_s18 = sshll.u32 %s534_s17, 4  ;;  %s456_s18 = int_to_ptr.vmem [resolvable:$true] %s455_s18 }
   0x9   :  { %157 = vmatprep.mubr.f32.mxu0 %v531_v5  ;;  %246 = vmatprep.mubr.f32.mxu1 %v531_v5  ;;  %p512_p1 = scmp.lt.s32.totalorder %s456_s18, %s456_s18 }
   0xb   :  { %42 = vperm.xlu0 %505, %v26_v10   ;;  %52 = vperm.xlu1 %506, %v28_v11   ;;  %v29_v11 = vld [vmem:[%s630_s3] sm:$0x7]  ;;  %s507_s3 = scalar_lea.vmem %s456_s18, 256 }
   0xc   :  { %467 = vmatmul.mubr.msk.f32.gmra.mrb[4].mxu0 %vm55_vm1, %v23_v12  ;;  %473 = vmatmul.mubr.msk.f32.gmra.mrb[4].mxu1 %vm55_vm1, %v23_v12  ;;  %p508_p0 = scmp.ne.s32.totalorder %s456_s18, %s507_s3  ;;  %p513_p2 = scmp.lt.s32.totalorder %s507_s3, %s507_s3 }
   0xd   :  { %163 = vmatprep.mubr.f32.mxu0 %v531_v5  ;;  %252 = vmatprep.mubr.f32.mxu1 %v531_v5 }
   0xe   :  { %p514_p3 = por %p513_p2, %p512_p1 }
   0xf   :  { %277 = vperm.xlu0 %505, %v30_v13  }
  0x10   :  { %468 = vmatmul.mubr.msk.f32.gmra.mrb[6].mxu0 %vm55_vm1, %v24_v14  ;;  %474 = vmatmul.mubr.msk.f32.gmra.mrb[6].mxu1 %vm55_vm1, %v24_v14  ;;  %p515_p4 = pnand %p514_p3, %p508_p0 }
  0x11   :  { %361 = vmatprep.mubr.f32.mxu0 %v531_v5  ;;  %432 = vmatprep.mubr.f32.mxu1 %v531_v5 }
  0x86   :  { %v38_v15 = vpop.permute.xlu0 %37  ;;  %v48_v23 = vpop.permute.xlu1 %47 }
  0x8a   :  { %v43_v20 = vpop.permute.xlu0 %42  ;;  %v53_v52 = vpop.permute.xlu1 %52 }
  0x8e   :  { %v278_v12 = vpop.permute.xlu0 %277 }
  0xd7   :  { %v147_v16 = vpop.f32.mrb[0].mxu0  ;;  %v236_v17 = vpop.f32.mrb[0].mxu1 }
  0xd8   :  { %v149_v18 = vpop.f32.mrb[1].mxu0  ;;  %v238_v19 = vpop.f32.mrb[1].mxu1  ;;  %v148_v21 = vadd.f32 %v147_v16, %v38_v15  ;;  %v237_v22 = vadd.f32 %v236_v17, %v38_v15 }
  0xd9   :  { %v150_v24 = vadd.f32 %v149_v18, %v38_v15  ;;  %v239_v25 = vadd.f32 %v238_v19, %v38_v15 }
  0xda   :  { %v259_v34 = vmax.f32 %v148_v21, 0.0  ;;  %v261_v35 = vmax.f32 %v237_v22, 0.0 }
  0xdb   :  { %v153_v26 = vpop.f32.mrb[2].mxu0  ;;  %v242_v27 = vpop.f32.mrb[2].mxu1  ;;  %v260_v38 = vmax.f32 %v150_v24, 0.0  ;;  %v262_v39 = vmax.f32 %v239_v25, 0.0 }
  0xdc   :  { %v154_v28 = vadd.f32 %v153_v26, %v43_v20  ;;  %v243_v29 = vadd.f32 %v242_v27, %v43_v20  ;;  %v155_v30 = vpop.f32.mrb[3].mxu0  ;;  %v244_v31 = vpop.f32.mrb[3].mxu1 }
  0xdd   :  { %v156_v32 = vadd.f32 %v155_v30, %v43_v20  ;;  %v245_v33 = vadd.f32 %v244_v31, %v43_v20 }
  0xde   :  { %v263_v36 = vmax.f32 %v154_v28, 0.0  ;;  %v265_v37 = vmax.f32 %v243_v29, 0.0 }
  0xdf   :  { %v264_v40 = vmax.f32 %v156_v32, 0.0  ;;  %v266_v41 = vmax.f32 %v245_v33, 0.0  ;;  %v159_v42 = vpop.f32.mrb[4].mxu0  ;;  %v248_v43 = vpop.f32.mrb[4].mxu1 }
  0xe0   :  { %v483_v44 = vpack.c.bf16 %v263_v36, %v259_v34  ;;  %v493_v45 = vpack.c.bf16 %v265_v37, %v261_v35  ;;  %v161_v46 = vpop.f32.mrb[5].mxu0  ;;  %v250_v47 = vpop.f32.mrb[5].mxu1  ;;  %v160_v50 = vadd.f32 %v159_v42, %v48_v23  ;;  %v249_v51 = vadd.f32 %v248_v43, %v48_v23 }
  0xe1   :  { %v481_v48 = vpack.c.bf16 %v264_v40, %v260_v38  ;;  %v491_v49 = vpack.c.bf16 %v266_v41, %v262_v39  ;;  %v162_v53 = vadd.f32 %v161_v46, %v48_v23  ;;  %v251_v54 = vadd.f32 %v250_v47, %v48_v23 }
  0xe2   :  { %v267_v63 = vmax.f32 %v160_v50, 0.0  ;;  %v269_v0 = vmax.f32 %v249_v51, 0.0 }
  0xe3   :  { %v165_v55 = vpop.f32.mrb[6].mxu0  ;;  %v254_v56 = vpop.f32.mrb[6].mxu1  ;;  %482 = vmatprep.subr.bf16.mxu0 %v481_v48  ;;  %492 = vmatprep.subr.bf16.mxu1 %v491_v49  ;;  %v268_v3 = vmax.f32 %v162_v53, 0.0  ;;  %v270_v4 = vmax.f32 %v251_v54, 0.0 }
  0xe4   :  { %v166_v57 = vadd.f32 %v165_v55, %v53_v52  ;;  %v255_v58 = vadd.f32 %v254_v56, %v53_v52  ;;  %v167_v59 = vpop.f32.mrb[7].mxu0  ;;  %v256_v60 = vpop.f32.mrb[7].mxu1  ;;  %484 = vmatpush1.bf16.msra.mxu0 %v483_v44  ;;  %494 = vmatpush1.bf16.msra.mxu1 %v493_v45 }
  0xe5   :  { %v168_v61 = vadd.f32 %v167_v59, %v53_v52  ;;  %v257_v62 = vadd.f32 %v256_v60, %v53_v52 }
  0xe6   :  { %v271_v1 = vmax.f32 %v166_v57, 0.0  ;;  %v273_v2 = vmax.f32 %v255_v58, 0.0 }
  0xe7   :  { %v272_v5 = vmax.f32 %v168_v61, 0.0  ;;  %v274_v6 = vmax.f32 %v257_v62, 0.0 }
  0xe8   :  { %v488_v7 = vpack.c.bf16 %v271_v1, %v267_v63  ;;  %v498_v8 = vpack.c.bf16 %v273_v2, %v269_v0 }
  0xe9   :  { %v485_v9 = vpack.c.bf16 %v272_v5, %v268_v3  ;;  %v495_v10 = vpack.c.bf16 %v274_v6, %v270_v4 }
  0xeb   :  { %487 = vmatprep.subr.msk.bf16.mxu0 %vm486_vm4, %v485_v9  ;;  %497 = vmatprep.subr.msk.bf16.mxu1 %vm486_vm4, %v495_v10 }
  0xec   :  { %490 = vmatpush1.bf16.msk.msra.mxu0 %vm486_vm4, %v488_v7  ;;  %500 = vmatpush1.bf16.msk.msra.mxu1 %vm486_vm4, %v498_v8 }
  0xef   :  { %477 = vmatmul.mubr.msk.f32.vlgmr.msra.gmra.mrb[8].mxu0 %vm280_vm5, %v29_v11  ;;  %480 = vmatmul.mubr.msk.f32.vlgmr.msra.gmra.mrb[8].mxu1 %vm280_vm5, %v29_v11 }
 0x1c2   :  { %v363_v13 = vpop.f32.mrb[8].mxu0  ;;  %v434_v14 = vpop.f32.mrb[8].mxu1 }
 0x1c3   :  { %v364_v15 = vadd.f32 %v363_v13, %v278_v12  ;;  %v435_v16 = vadd.f32 %v434_v14, %v278_v12  ;;  %v365_v17 = vpop.f32.mrb[9].mxu0  ;;  %v436_v18 = vpop.f32.mrb[9].mxu1 }
 0x1c4   :  { %v366_v19 = vadd.f32 %v365_v17, %v278_v12  ;;  %v437_v20 = vadd.f32 %v436_v18, %v278_v12 }
 0x1c6   :  { %v443_v21 = vcombine.low %v364_v15, %v366_v19  ;;  %v444_v22 = vcombine.low %v435_v16, %v437_v20 }
 0x1c8   :  { %447 = vst [vmem:[#allocation2] sm:$0x77] %v443_v21  ;;  %448 = vst [vmem:[#allocation2 + $0x8] sm:$0x77] %v444_v22 }
 0x1c9   :  { %518 = shalt.err (!%p515_p4)
}
 0x1ca   :  { %s519_s21 = scalar_lea.hbm %s632_s5, 256 }
 0x1cb   :  { %p520_p5 = scmp.ne.s32.totalorder %s632_s5, %s519_s21  ;;  %p523_p6 = scmp.lt.u32.totalorder %s519_s21, %s632_s5 }
 0x1cd   :  { %p525_p7 = pnand %p523_p6, %p520_p5 }
 0x1cf   :  { %528 = shalt.err (!%p525_p7)
}
 0x1d0   :  { %458 = dma.vmem_to_hbm [thread:$0]  %s456_s18, 256, %s632_s5, [#allocation3]  }
 0x1d1   :  { %529 = dma.done.wait [#allocation3], 256  }
 0x1d2   :  { %530 = vsyncadd [#allocation3], 4294967040 }
 0x1d3   :  { %462 = vsyncpa [#allocation3], 1 }

</bundles_post_ra>
